<compile_context>
chip_gen: v7x
topology: tpu7x:2x2x1
jax: 0.10.0
libtpu: 0.0.40
codegen_flags: <defaults>
</compile_context>

<pallas_src>
import jax
import jax.numpy as jnp
from jax.experimental import pallas as pl
from jax.experimental.pallas import tpu as pltpu

INPUT_SIZE = 784
HIDDEN_SIZE = 128
ENCODING_SIZE = 32


def _round_up(x, m):
    return ((x + m - 1) // m) * m


def _autoencoder_kernel(x_ref,
                        w1_ref, b1_ref,
                        w2_ref, b2_ref,
                        w3_ref, b3_ref,
                        w4_ref, b4_ref,
                        o_ref):
    """One batch tile: 4 matmuls (bf16 operands, fp32 accumulate) + fp32 epilogue."""
    # fp32 input tile -> bf16 for the MXU (cast is hidden under DMA/MXU).
    x = x_ref[...].astype(jnp.bfloat16)                                     # (TB, 784)

    # fc1 + relu
    h = jnp.dot(x, w1_ref[...], preferred_element_type=jnp.float32) + b1_ref[...]
    h = jnp.maximum(h, 0.0).astype(jnp.bfloat16)                            # (TB, 128)

    # fc2 + relu (encoding)
    z = jnp.dot(h, w2_ref[...], preferred_element_type=jnp.float32) + b2_ref[...]
    z = jnp.maximum(z, 0.0).astype(jnp.bfloat16)                            # (TB, 32)

    # fc3 + relu
    h2 = jnp.dot(z, w3_ref[...], preferred_element_type=jnp.float32) + b3_ref[...]
    h2 = jnp.maximum(h2, 0.0).astype(jnp.bfloat16)                          # (TB, 128)

    # fc4 + sigmoid (fp32 epilogue, bf16 store)
    y = jnp.dot(h2, w4_ref[...], preferred_element_type=jnp.float32) + b4_ref[...]
    o_ref[...] = jax.nn.sigmoid(y).astype(o_ref.dtype)                      # (TB, 784)


def autoencoder_forward(x, params, *, block_batch=512):
    """x: (B, 784) float32. params: w1..w4 (in,out), b1..b4 (1,out). Returns (B, 784) bf16."""
    B = x.shape[0]

    # --- operands: bf16 weights (natural shapes, no padding), fp32 biases ---
    w1 = params["w1"].astype(jnp.bfloat16)   # (784, 128)
    w2 = params["w2"].astype(jnp.bfloat16)   # (128,  32)
    w3 = params["w3"].astype(jnp.bfloat16)   # ( 32, 128)
    w4 = params["w4"].astype(jnp.bfloat16)   # (128, 784)
    b1 = params["b1"].astype(jnp.float32)    # (1, 128)
    b2 = params["b2"].astype(jnp.float32)    # (1,  32)
    b3 = params["b3"].astype(jnp.float32)    # (1, 128)
    b4 = params["b4"].astype(jnp.float32)    # (1, 784)

    # --- batch tiling ---
    # tb is a multiple of 8 (BlockSpec (8,128) rule); prefer >=2 grid steps so
    # the "parallel" batch axis can be sharded across v7x's 2 TensorCores.
    half = _round_up(pl.cdiv(B, 2), 8)
    tb = max(8, min(_round_up(block_batch, 8), half))
    b_pad = _round_up(B, tb)
    n_blocks = b_pad // tb
    xp = x if b_pad == B else jnp.pad(x, ((0, b_pad - B), (0, 0)))

    def resident_spec(arr):
        # Constant block index -> DMA'd once, VMEM-resident across grid steps.
        return pl.BlockSpec(arr.shape, lambda i: (0, 0))

    in_specs = [
        pl.BlockSpec((tb, INPUT_SIZE), lambda i: (i, 0)),   # x: one fp32 batch tile per step
        resident_spec(w1), resident_spec(b1),
        resident_spec(w2), resident_spec(b2),
        resident_spec(w3), resident_spec(b3),
        resident_spec(w4), resident_spec(b4),
    ]
    out_spec = pl.BlockSpec((tb, INPUT_SIZE), lambda i: (i, 0))

    # --- advisory cost estimate for the XLA scheduler ---
    flops = 2 * b_pad * (INPUT_SIZE * HIDDEN_SIZE
                         + HIDDEN_SIZE * ENCODING_SIZE
                         + ENCODING_SIZE * HIDDEN_SIZE
                         + HIDDEN_SIZE * INPUT_SIZE)
    transcendentals = b_pad * INPUT_SIZE  # sigmoid
    param_bytes = sum(int(a.size) * a.dtype.itemsize
                      for a in (w1, b1, w2, b2, w3, b3, w4, b4))
    bytes_accessed = param_bytes + b_pad * INPUT_SIZE * 4 + b_pad * INPUT_SIZE * 2
    cost = pl.CostEstimate(flops=flops,
                           transcendentals=transcendentals,
                           bytes_accessed=bytes_accessed)

    # --- VMEM budget: double-buffered params + x/out tiles, plus fp32/bf16
    #     in-kernel intermediates and headroom; capped at 32 MiB for v7x. ---
    io_tiles = 2 * (tb * INPUT_SIZE * 4      # x fp32, double-buffered
                    + tb * INPUT_SIZE * 2)   # out bf16, double-buffered
    intermediates = (tb * INPUT_SIZE * 2     # x bf16
                     + tb * INPUT_SIZE * 4   # y fp32
                     + 2 * tb * HIDDEN_SIZE * (4 + 2)   # h, h2 fp32 + bf16
                     + tb * ENCODING_SIZE * (4 + 2))    # z fp32 + bf16
    vmem_limit = min(2 * param_bytes + io_tiles + intermediates + (4 << 20),
                     32 << 20)

    out = pl.pallas_call(
        _autoencoder_kernel,
        out_shape=jax.ShapeDtypeStruct((b_pad, INPUT_SIZE), jnp.bfloat16),
        grid_spec=pltpu.PrefetchScalarGridSpec(
            num_scalar_prefetch=0,
            grid=(n_blocks,),
            in_specs=in_specs,
            out_specs=out_spec,
        ),
        compiler_params=pltpu.CompilerParams(
            dimension_semantics=("parallel",),   # batch axis: shard across TCs on v7x
            vmem_limit_bytes=int(vmem_limit),
        ),
        cost_estimate=cost,
    )(xp, w1, b1, w2, b2, w3, b3, w4, b4)

    return out if b_pad == B else out[:B]


def init_params(key):
    """Deterministic init mimicking nn.Linear's U(-1/sqrt(fan_in), 1/sqrt(fan_in))."""
    dims = [
        (INPUT_SIZE, HIDDEN_SIZE),     # fc1
        (HIDDEN_SIZE, ENCODING_SIZE),  # fc2
        (ENCODING_SIZE, HIDDEN_SIZE),  # fc3
        (HIDDEN_SIZE, INPUT_SIZE),     # fc4
    ]
    params = {}
    keys = jax.random.split(key, 2 * len(dims))
    for i, (fan_in, fan_out) in enumerate(dims):
        bound = 1.0 / jnp.sqrt(jnp.float32(fan_in))
        params[f"w{i+1}"] = jax.random.uniform(
            keys[2 * i], (fan_in, fan_out), jnp.float32, -bound, bound)
        params[f"b{i+1}"] = jax.random.uniform(
            keys[2 * i + 1], (1, fan_out), jnp.float32, -bound, bound)
    return params


def autoencoder_ref(x, params):
    """Pure-JAX fp32 reference for correctness check."""
    h = jnp.maximum(x @ params["w1"] + params["b1"], 0.0)
    z = jnp.maximum(h @ params["w2"] + params["b2"], 0.0)
    h2 = jnp.maximum(z @ params["w3"] + params["b3"], 0.0)
    return jax.nn.sigmoid(h2 @ params["w4"] + params["b4"])


if __name__ == "__main__":
    key = jax.random.PRNGKey(0)
    pkey, xkey = jax.random.split(key)

    params = init_params(pkey)
    batch = 16
    x = jax.random.uniform(xkey, (batch, INPUT_SIZE), jnp.float32)  # "pixel" inputs in [0,1)

    # block_batch=8 -> grid=(2,), exercising the pipelined / parallel batch grid.
    out = autoencoder_forward(x, params, block_batch=8)
    out = jax.block_until_ready(out)

    ref = autoencoder_ref(x, params)
    assert out.shape == (batch, INPUT_SIZE)
    assert out.dtype == jnp.bfloat16
    max_err = float(jnp.max(jnp.abs(out.astype(jnp.float32) - ref)))
    # bf16 matmul operands + bf16 output store (fp32 accumulation/epilogue).
    assert max_err < 3e-2, f"mismatch vs fp32 reference: max abs err {max_err}"

    print("KERNEL_OK")
</pallas_src>

<mosaic_0001>
module attributes {stable_mosaic.version = 11 : i64} {
  func.func @_autoencoder_kernel(%arg0: i32, %arg1: memref<8x784xf32, #tpu.memory_space<vmem>>, %arg2: memref<784x128xbf16, #tpu.memory_space<vmem>>, %arg3: memref<1x128xf32, #tpu.memory_space<vmem>>, %arg4: memref<128x32xbf16, #tpu.memory_space<vmem>>, %arg5: memref<1x32xf32, #tpu.memory_space<vmem>>, %arg6: memref<32x128xbf16, #tpu.memory_space<vmem>>, %arg7: memref<1x128xf32, #tpu.memory_space<vmem>>, %arg8: memref<128x784xbf16, #tpu.memory_space<vmem>>, %arg9: memref<1x784xf32, #tpu.memory_space<vmem>>, %arg10: memref<8x784xbf16, #tpu.memory_space<vmem>>) attributes {dimension_semantics = [#tpu.dimension_semantics<parallel>], iteration_bounds = array<i64: 2>, scalar_prefetch = 0 : i64, scratch_operands = 0 : i64, tpu.core_type = #tpu.core_type<tc>, window_params = [{transform_indices = @transform_0, window_bounds = array<i64: 8, 784>}, {pipeline_mode = #tpu.pipeline_mode<synchronous>, transform_indices = @transform_1, window_bounds = array<i64: 784, 128>}, {pipeline_mode = #tpu.pipeline_mode<synchronous>, transform_indices = @transform_2, window_bounds = array<i64: 1, 128>}, {pipeline_mode = #tpu.pipeline_mode<synchronous>, transform_indices = @transform_3, window_bounds = array<i64: 128, 32>}, {pipeline_mode = #tpu.pipeline_mode<synchronous>, transform_indices = @transform_4, window_bounds = array<i64: 1, 32>}, {pipeline_mode = #tpu.pipeline_mode<synchronous>, transform_indices = @transform_5, window_bounds = array<i64: 32, 128>}, {pipeline_mode = #tpu.pipeline_mode<synchronous>, transform_indices = @transform_6, window_bounds = array<i64: 1, 128>}, {pipeline_mode = #tpu.pipeline_mode<synchronous>, transform_indices = @transform_7, window_bounds = array<i64: 128, 784>}, {pipeline_mode = #tpu.pipeline_mode<synchronous>, transform_indices = @transform_8, window_bounds = array<i64: 1, 784>}, {transform_indices = @transform_9, window_bounds = array<i64: 8, 784>}]} {
    %c0 = arith.constant 0 : index
    %c0_0 = arith.constant 0 : index
    %0 = vector.load %arg1[%c0, %c0_0] : memref<8x784xf32, #tpu.memory_space<vmem>>, vector<8x784xf32>
    %1 = arith.truncf %0 : vector<8x784xf32> to vector<8x784xbf16>
    %c0_1 = arith.constant 0 : index
    %c0_2 = arith.constant 0 : index
    %2 = vector.load %arg2[%c0_1, %c0_2] : memref<784x128xbf16, #tpu.memory_space<vmem>>, vector<784x128xbf16>
    %cst = arith.constant dense<0.000000e+00> : vector<8x128xf32>
    %3 = tpu.matmul %1, %2, %cst {dimension_numbers = #tpu.dot_dimension_numbers<[1], [0], [0], [1], [0, 0, 1, 1], [], []>} : vector<8x784xbf16>, vector<784x128xbf16>, vector<8x128xf32> -> vector<8x128xf32>
    %c0_3 = arith.constant 0 : index
    %c0_4 = arith.constant 0 : index
    %4 = vector.load %arg3[%c0_3, %c0_4] : memref<1x128xf32, #tpu.memory_space<vmem>>, vector<1x128xf32>
    %5 = vector.broadcast %4 : vector<1x128xf32> to vector<8x128xf32>
    %6 = arith.addf %3, %5 : vector<8x128xf32>
    %cst_5 = arith.constant 0.000000e+00 : f32
    %7 = vector.broadcast %cst_5 : f32 to vector<8x128xf32>
    %8 = arith.maximumf %6, %7 : vector<8x128xf32>
    %9 = arith.truncf %8 : vector<8x128xf32> to vector<8x128xbf16>
    %c0_6 = arith.constant 0 : index
    %c0_7 = arith.constant 0 : index
    %10 = vector.load %arg4[%c0_6, %c0_7] : memref<128x32xbf16, #tpu.memory_space<vmem>>, vector<128x32xbf16>
    %cst_8 = arith.constant dense<0.000000e+00> : vector<8x32xf32>
    %11 = tpu.matmul %9, %10, %cst_8 {dimension_numbers = #tpu.dot_dimension_numbers<[1], [0], [0], [1], [0, 0, 1, 1], [], []>} : vector<8x128xbf16>, vector<128x32xbf16>, vector<8x32xf32> -> vector<8x32xf32>
    %c0_9 = arith.constant 0 : index
    %c0_10 = arith.constant 0 : index
    %12 = vector.load %arg5[%c0_9, %c0_10] : memref<1x32xf32, #tpu.memory_space<vmem>>, vector<1x32xf32>
    %13 = vector.broadcast %12 : vector<1x32xf32> to vector<8x32xf32>
    %14 = arith.addf %11, %13 : vector<8x32xf32>
    %cst_11 = arith.constant 0.000000e+00 : f32
    %15 = vector.broadcast %cst_11 : f32 to vector<8x32xf32>
    %16 = arith.maximumf %14, %15 : vector<8x32xf32>
    %17 = arith.truncf %16 : vector<8x32xf32> to vector<8x32xbf16>
    %c0_12 = arith.constant 0 : index
    %c0_13 = arith.constant 0 : index
    %18 = vector.load %arg6[%c0_12, %c0_13] : memref<32x128xbf16, #tpu.memory_space<vmem>>, vector<32x128xbf16>
    %cst_14 = arith.constant dense<0.000000e+00> : vector<8x128xf32>
    %19 = tpu.matmul %17, %18, %cst_14 {dimension_numbers = #tpu.dot_dimension_numbers<[1], [0], [0], [1], [0, 0, 1, 1], [], []>} : vector<8x32xbf16>, vector<32x128xbf16>, vector<8x128xf32> -> vector<8x128xf32>
    %c0_15 = arith.constant 0 : index
    %c0_16 = arith.constant 0 : index
    %20 = vector.load %arg7[%c0_15, %c0_16] : memref<1x128xf32, #tpu.memory_space<vmem>>, vector<1x128xf32>
    %21 = vector.broadcast %20 : vector<1x128xf32> to vector<8x128xf32>
    %22 = arith.addf %19, %21 : vector<8x128xf32>
    %cst_17 = arith.constant 0.000000e+00 : f32
    %23 = vector.broadcast %cst_17 : f32 to vector<8x128xf32>
    %24 = arith.maximumf %22, %23 : vector<8x128xf32>
    %25 = arith.truncf %24 : vector<8x128xf32> to vector<8x128xbf16>
    %c0_18 = arith.constant 0 : index
    %c0_19 = arith.constant 0 : index
    %26 = vector.load %arg8[%c0_18, %c0_19] : memref<128x784xbf16, #tpu.memory_space<vmem>>, vector<128x784xbf16>
    %cst_20 = arith.constant dense<0.000000e+00> : vector<8x784xf32>
    %27 = tpu.matmul %25, %26, %cst_20 {dimension_numbers = #tpu.dot_dimension_numbers<[1], [0], [0], [1], [0, 0, 1, 1], [], []>} : vector<8x128xbf16>, vector<128x784xbf16>, vector<8x784xf32> -> vector<8x784xf32>
    %c0_21 = arith.constant 0 : index
    %c0_22 = arith.constant 0 : index
    %28 = vector.load %arg9[%c0_21, %c0_22] : memref<1x784xf32, #tpu.memory_space<vmem>>, vector<1x784xf32>
    %29 = vector.broadcast %28 : vector<1x784xf32> to vector<8x784xf32>
    %30 = arith.addf %27, %29 : vector<8x784xf32>
    %31 = arith.negf %30 : vector<8x784xf32>
    %32 = math.exp %31 : vector<8x784xf32>
    %cst_23 = arith.constant 1.000000e+00 : f32
    %33 = vector.broadcast %cst_23 : f32 to vector<8x784xf32>
    %34 = arith.addf %33, %32 : vector<8x784xf32>
    %35 = arith.divf %33, %34 : vector<8x784xf32>
    %36 = arith.truncf %35 : vector<8x784xf32> to vector<8x784xbf16>
    %c0_24 = arith.constant 0 : index
    %c0_25 = arith.constant 0 : index
    %37 = vector.load %arg10[%c0_24, %c0_25] : memref<8x784xbf16, #tpu.memory_space<vmem>>, vector<8x784xbf16>
    tpu.vector_store %arg10[%c0_24, %c0_25], %36 {strides = array<i32>} : memref<8x784xbf16, #tpu.memory_space<vmem>>, vector<8x784xbf16>,
    return
  }
  func.func @transform_0(%arg0: i32) -> (i32, i32) {
    %c0_i32 = arith.constant 0 : i32
    %c0_i32_0 = arith.constant 0 : i32
    return %arg0, %c0_i32 : i32, i32
  }
  func.func @transform_1(%arg0: i32) -> (i32, i32) {
    %c0_i32 = arith.constant 0 : i32
    %c0_i32_0 = arith.constant 0 : i32
    %c0_i32_1 = arith.constant 0 : i32
    return %c0_i32, %c0_i32_0 : i32, i32
  }
  func.func @transform_2(%arg0: i32) -> (i32, i32) {
    %c0_i32 = arith.constant 0 : i32
    %c0_i32_0 = arith.constant 0 : i32
    %c0_i32_1 = arith.constant 0 : i32
    return %c0_i32, %c0_i32_0 : i32, i32
  }
  func.func @transform_3(%arg0: i32) -> (i32, i32) {
    %c0_i32 = arith.constant 0 : i32
    %c0_i32_0 = arith.constant 0 : i32
    %c0_i32_1 = arith.constant 0 : i32
    return %c0_i32, %c0_i32_0 : i32, i32
  }
  func.func @transform_4(%arg0: i32) -> (i32, i32) {
    %c0_i32 = arith.constant 0 : i32
    %c0_i32_0 = arith.constant 0 : i32
    %c0_i32_1 = arith.constant 0 : i32
    return %c0_i32, %c0_i32_0 : i32, i32
  }
  func.func @transform_5(%arg0: i32) -> (i32, i32) {
    %c0_i32 = arith.constant 0 : i32
    %c0_i32_0 = arith.constant 0 : i32
    %c0_i32_1 = arith.constant 0 : i32
    return %c0_i32, %c0_i32_0 : i32, i32
  }
  func.func @transform_6(%arg0: i32) -> (i32, i32) {
    %c0_i32 = arith.constant 0 : i32
    %c0_i32_0 = arith.constant 0 : i32
    %c0_i32_1 = arith.constant 0 : i32
    return %c0_i32, %c0_i32_0 : i32, i32
  }
  func.func @transform_7(%arg0: i32) -> (i32, i32) {
    %c0_i32 = arith.constant 0 : i32
    %c0_i32_0 = arith.constant 0 : i32
    %c0_i32_1 = arith.constant 0 : i32
    return %c0_i32, %c0_i32_0 : i32, i32
  }
  func.func @transform_8(%arg0: i32) -> (i32, i32) {
    %c0_i32 = arith.constant 0 : i32
    %c0_i32_0 = arith.constant 0 : i32
    %c0_i32_1 = arith.constant 0 : i32
    return %c0_i32, %c0_i32_0 : i32, i32
  }
  func.func @transform_9(%arg0: i32) -> (i32, i32) {
    %c0_i32 = arith.constant 0 : i32
    %c0_i32_0 = arith.constant 0 : i32
    return %arg0, %c0_i32 : i32, i32
  }
}

</mosaic_0001>

<bundles_post_ra>
// kernel: tpu_custom_call.1
= control target key start
LH: loop header
LB: loop body
LE: loop exit
PB: predicated region body
PF: predicated region fallthrough
CT: control target
= control target key end

     0   :  { %14 = vsyncpa [#allocation3], 0  ;;  %s2915_s0 = inlined_call_operand.vmem [shape: f32[16,784], index: 0, kind: input, shape index: {}]   ;;  %s2916_s1 = inlined_call_operand.vmem [shape: bf16[784,128], index: 1, kind: input, shape index: {}]   ;;  %s2917_s2 = inlined_call_operand.vmem [shape: f32[1,128], index: 2, kind: input, shape index: {}]   ;;  %s2918_s3 = inlined_call_operand.vmem [shape: bf16[128,32], index: 3, kind: input, shape index: {}]   ;;  %s2919_s4 = inlined_call_operand.vmem [shape: f32[1,32], index: 4, kind: input, shape index: {}]   ;;  %s2920_s5 = inlined_call_operand.vmem [shape: bf16[32,128], index: 5, kind: input, shape index: {}]   ;;  %s2921_s6 = inlined_call_operand.vmem [shape: f32[1,128], index: 6, kind: input, shape index: {}]   ;;  %s2922_s7 = inlined_call_operand.vmem [shape: bf16[128,784], index: 7, kind: input, shape index: {}]   ;;  %s2923_s8 = inlined_call_operand.vmem [shape: f32[1,784], index: 8, kind: input, shape index: {}]   ;;  %s2924_s9 = inlined_call_operand.hbm [shape: bf16[16,784], index: 9, kind: output, shape index: {}]  }
   0x1   :  { %16 = vsyncpa [#allocation3 + $0x1], 0  ;;  %s2411_s30 = smov 0   ;;  %s2413_s10 = smov 0  }
   0x2   :  { %s2415_s11 = smov 0   ;;  %s2417_s12 = smov 0  }
   0x3 LB: > { %s2432_s13 = sadd.s32 4294967295, %s2355_s12   ;;  %s1795_s14 = sadd.s32 4294967294, %s2355_s12   ;;  %s2355_s12 = sphi %s2417_s12, %s2930_s12   ;;  %s2351_s11 = sphi %s2415_s11, %s2929_s11   ;;  %s2347_s10 = sphi %s2413_s10, %s2928_s10   ;;  %s2343_s30 = sphi %s2411_s30, %s2927_s30  }
   0x4   : > { %s2436_s15 = sadd.s32 1, %s2355_s12   ;;  %s223_s16 = sadd.s32 1, %s2351_s11 }
   0x5   : > { %s220_s17 = ssub.s32 %s2355_s12, %s2436_s15  ;;  %p233_p0 = scmp.ne.s32.totalorder %s2351_s11, %s2347_s10 }
   0x6   : > { %p221_p1 = scmp.eq.s32.totalorder %s220_s17, 0  ;;  %p234_p2 = scmp.eq.s32.totalorder %s2432_s13, 1 }
   0x7   : > { %p239_p3 = scmp.ne.s32.totalorder %s2347_s10, %s2343_s30  ;;  %p240_p4 = scmp.eq.s32.totalorder %s1795_s14, 1 }
   0x8   : > { %s2447_s18 = scalar_select %p221_p1, %s2351_s11, %s223_s16  }
   0x9   : > { %p2449_p5 = por %p234_p2, %p233_p0  ;;  %p2453_p6 = por %p240_p4, %p239_p3 }
   0xa   : > { %p1798_p7 = scmp.ge.s32.totalorder %s2355_s12, 1  ;;  %p290_p8 = scmp.lt.s32.totalorder %s2355_s12, 3 }
   0xc   : > { %p291_p9 = pnand %p1798_p7, %p290_p8 }
   0xd   : > { %v2126_v0 = vld [vmem:[%s2916_s1 + $0x40] sm:$0xff] (!%p291_p9)   ;;  %v2130_v4 = vld [vmem:[%s2916_s1 + $0x48] sm:$0xff] (!%p291_p9)   ;;  %v2134_v8 = vld [vmem:[%s2916_s1 + $0x50] sm:$0xff] (!%p291_p9)   ;;  %p326_p10 = scmp.lt.s32.totalorder (!%p291_p9), %s2432_s13, 1  ;;  %v2357_v44 = vmov (!%p291_p9), 0.0   ;;  %vm2358_vm0 = vmmov (!%p291_p9), 0  }
   0xe   : > { %294 = sbr.rel (%p291_p9) target bundleno = 1027 (0x403), region = 56  ;;  %v2127_v1 = vld [vmem:[%s2916_s1] sm:$0xff] (!%p291_p9)   ;;  %1938 = vmatprep.subr.bf16.mxu0 (!%p291_p9), %v2126_v0  ;;  %v2131_v5 = vld [vmem:[%s2916_s1 + $0x8] sm:$0xff] (!%p291_p9)   ;;  %v2135_v9 = vld [vmem:[%s2916_s1 + $0x10] sm:$0xff] (!%p291_p9)   ;;  %vm745_vm1 = vcmask (!%p291_p9), 130048   ;;  %vm1047_vm2 = vcmask (!%p291_p9), 261120  }
   0xf   : > { %v2128_v2 = vld [vmem:[%s2916_s1 + $0xc0] sm:$0xff] (!%p291_p9)   ;;  %1939 = vmatpush3.bf16.msra.mxu0 (!%p291_p9), %v2127_v1  ;;  %v2132_v6 = vld [vmem:[%s2916_s1 + $0xc8] sm:$0xff] (!%p291_p9)   ;;  %v2136_v10 = vld [vmem:[%s2916_s1 + $0xd0] sm:$0xff] (!%p291_p9)   ;;  %s323_s29 = sand.u32 (!%p291_p9), 1, %s2347_s10   ;;  %s2083_s16 = smul.u32 (!%p291_p9), 448, %s2432_s13  ;;  %vm1719_vm3 = vcmask (!%p291_p9), 125952  }
  0x10   : > { %v2129_v3 = vld [vmem:[%s2916_s1 + $0x80] sm:$0xff] (!%p291_p9)   ;;  %1960 = vmatprep.subr.bf16.mxu1 (!%p291_p9), %v2128_v2  ;;  %1940 = vmatprep.subr.bf16.mxu0 (!%p291_p9), %v2130_v4  ;;  %v2133_v7 = vld [vmem:[%s2916_s1 + $0x88] sm:$0xff] (!%p291_p9)   ;;  %v2137_v11 = vld [vmem:[%s2916_s1 + $0x90] sm:$0xff] (!%p291_p9)   ;;  %s2360_s25 = smov (!%p291_p9), [#allocation2]  }
  0x11   : > { %1961 = vmatpush3.bf16.msra.mxu1 (!%p291_p9), %v2129_v3  ;;  %v2138_v12 = vld [vmem:[%s2916_s1 + $0x58] sm:$0xff] (!%p291_p9)   ;;  %v2142_v16 = vld [vmem:[%s2916_s1 + $0x60] sm:$0xff] (!%p291_p9)   ;;  %v2146_v20 = vld [vmem:[%s2916_s1 + $0x68] sm:$0xff] (!%p291_p9)   ;;  %s2869_s22 = scalar_lea.hbm (!%p291_p9), %s2924_s9, %s2083_s16  ;;  %s2297_s26 = sshll.u32 (!%p291_p9), %s2360_s25, 4  ;;  %s2298_s26 = int_to_ptr.vmem [resolvable:$false] %s2297_s26 }
  0x12   : > { %1962 = vmatprep.subr.bf16.mxu1 (!%p291_p9), %v2132_v6  ;;  %v2139_v13 = vld [vmem:[%s2916_s1 + $0x18] sm:$0xff] (!%p291_p9)   ;;  %v2143_v17 = vld [vmem:[%s2916_s1 + $0x20] sm:$0xff] (!%p291_p9)   ;;  %v2147_v21 = vld [vmem:[%s2916_s1 + $0x28] sm:$0xff] (!%p291_p9)   ;;  %s2299_s28 = scalar_lea.vmem (!%p291_p9), %s2298_s26, 896 }
  0x13   : > { %1941 = vmatpush3.bf16.msra.mxu0 (!%p291_p9), %v2131_v5  ;;  %v2140_v14 = vld [vmem:[%s2916_s1 + $0xd8] sm:$0xff] (!%p291_p9)   ;;  %v2144_v18 = vld [vmem:[%s2916_s1 + $0xe0] sm:$0xff] (!%p291_p9)   ;;  %v2148_v22 = vld [vmem:[%s2916_s1 + $0xe8] sm:$0xff] (!%p291_p9)  }
  0x14   : > { %1942 = vmatprep.subr.bf16.mxu0 (!%p291_p9), %v2134_v8  ;;  %v2141_v15 = vld [vmem:[%s2916_s1 + $0x98] sm:$0xff] (!%p291_p9)   ;;  %v2145_v19 = vld [vmem:[%s2916_s1 + $0xa0] sm:$0xff] (!%p291_p9)   ;;  %v2149_v23 = vld [vmem:[%s2916_s1 + $0xa8] sm:$0xff] (!%p291_p9)  }
  0x15   : > { %1963 = vmatpush3.bf16.msra.mxu1 %v2133_v7  ;;  %s327_s27 = scalar_select %p326_p10, %s2432_s13, 1  ;;  %v2150_v24 = vld [vmem:[%s2916_s1 + $0x70] sm:$0xff]   ;;  %v2154_v28 = vld [vmem:[%s2916_s1 + $0x78] sm:$0xff]   ;;  %v2158_v36 = vld [vmem:[%s2916_s1 + $0x140] sm:$0xff]  }
  0x16   : > { %1964 = vmatprep.subr.bf16.mxu1 %v2136_v10  ;;  %v2151_v25 = vld [vmem:[%s2916_s1 + $0x30] sm:$0xff]   ;;  %v2155_v29 = vld [vmem:[%s2916_s1 + $0x38] sm:$0xff]   ;;  %v2159_v39 = vld [vmem:[%s2916_s1 + $0x100] sm:$0xff]   ;;  %s1722_s13 = scalar_lea.sflag [#allocation3], %s323_s29 }
  0x17   : > { %1943 = vmatpush3.bf16.msra.mxu0 %v2135_v9  ;;  %s2082_s24 = smul.u32 56, %s327_s27  ;;  %v2152_v26 = vld [vmem:[%s2916_s1 + $0xf0] sm:$0xff]   ;;  %v2156_v30 = vld [vmem:[%s2916_s1 + $0xf8] sm:$0xff]   ;;  %v2160_v42 = vld [vmem:[%s2916_s1 + $0x148] sm:$0xff]  }
  0x18   : > { %1944 = vmatprep.subr.bf16.mxu0 %v2138_v12  ;;  %v2153_v27 = vld [vmem:[%s2916_s1 + $0xb0] sm:$0xff]   ;;  %v2157_v33 = vld [vmem:[%s2916_s1 + $0xb8] sm:$0xff]   ;;  %v2161_v43 = vld [vmem:[%s2916_s1 + $0x108] sm:$0xff]  }
  0x19   : > { %1965 = vmatpush3.bf16.msra.mxu1 %v2137_v11  ;;  %s2551_s23 = scalar_lea.vmem %s2915_s0, %s2082_s24  ;;  %v2162_v45 = vld [vmem:[%s2916_s1 + $0x150] sm:$0xff]   ;;  %v2164_v47 = vld [vmem:[%s2916_s1 + $0x158] sm:$0xff]   ;;  %v2166_v49 = vld [vmem:[%s2916_s1 + $0x160] sm:$0xff]   ;;  %s2081_s24 = smul.u32 28, %s323_s29 }
  0x1a   : > { %1966 = vmatprep.subr.bf16.mxu1 %v2140_v14  ;;  %v333_v31 = vld [vmem:[%s2551_s23 + $0x8] sm:$0xff]  ;;  %v332_v34 = vld [vmem:[%s2551_s23] sm:$0xff]  ;;  %v335_v37 = vld [vmem:[%s2551_s23 + $0x18] sm:$0xff] }
  0x1b   : > { %1945 = vmatpush3.bf16.msra.mxu0 %v2139_v13  ;;  %v340_v32 = vpack.c.bf16 %v333_v31, %v333_v31  ;;  %v339_v35 = vpack.c.bf16 %v332_v34, %v332_v34  ;;  %v342_v38 = vpack.c.bf16 %v335_v37, %v335_v37  ;;  %v334_v40 = vld [vmem:[%s2551_s23 + $0x10] sm:$0xff]  ;;  %v2165_v48 = vld [vmem:[%s2916_s1 + $0x118] sm:$0xff]   ;;  %v2167_v50 = vld [vmem:[%s2916_s1 + $0x120] sm:$0xff]   ;;  %s2860_s14 = scalar_lea.vmem [#allocation2], %s2081_s24 }
  0x1c   : > { %1946 = vmatprep.subr.bf16.mxu0 %v2142_v16  ;;  %v341_v41 = vpack.c.bf16 %v334_v40, %v334_v40  ;;  %v2163_v46 = vld [vmem:[%s2916_s1 + $0x110] sm:$0xff]   ;;  %v2168_v51 = vld [vmem:[%s2916_s1 + $0x168] sm:$0xff]   ;;  %v2174_v53 = vld [vmem:[%s2916_s1 + $0x180] sm:$0xff]   ;;  %s1736_s17 = sshll.u32 %s2860_s14, 4  ;;  %s2871_s17 = int_to_ptr.vmem [resolvable:$true] %s1736_s17 }
  0x1d   : > { %1967 = vmatpush3.bf16.msra.mxu1 %v2141_v15  ;;  %781 = vmatprep.mubr.bf16.mxu0 %v340_v32  ;;  %v2169_v52 = vld [vmem:[%s2916_s1 + $0x128] sm:$0xff]   ;;  %v2170_v55 = vld [vmem:[%s2916_s1 + $0x170] sm:$0xff]   ;;  %v2172_v60 = vld [vmem:[%s2916_s1 + $0x178] sm:$0xff]   ;;  %p2300_p0 = scmp.lt.s32.totalorder %s2871_s17, %s2298_s26 }
  0x1e   : > { %1968 = vmatprep.subr.bf16.mxu1 %v2144_v18  ;;  %821 = vmatprep.mubr.bf16.mxu1 %v342_v38  ;;  %v337_v54 = vld [vmem:[%s2551_s23 + $0x28] sm:$0xff]  ;;  %v338_v57 = vld [vmem:[%s2551_s23 + $0x30] sm:$0xff]  ;;  %v2173_v61 = vld [vmem:[%s2916_s1 + $0x138] sm:$0xff]  }
  0x1f   : > { %1947 = vmatpush3.bf16.msra.mxu0 %v2143_v17  ;;  %v344_v56 = vpack.c.bf16 %v337_v54, %v337_v54  ;;  %v345_v58 = vpack.c.bf16 %v338_v57, %v338_v57  ;;  %v2171_v59 = vld [vmem:[%s2916_s1 + $0x130] sm:$0xff]   ;;  %v336_v62 = vld [vmem:[%s2551_s23 + $0x20] sm:$0xff]  ;;  %v2176_v1 = vld [vmem:[%s2918_s3 + $0x8] sm:$0xff]   ;;  %s2293_s23 = scalar_lea.vmem %s2871_s17, 448 }
  0x20   : > { %1948 = vmatprep.subr.bf16.mxu0 %v2146_v20  ;;  %v343_v63 = vpack.c.bf16 %v336_v62, %v336_v62  ;;  %v2175_v0 = vld [vmem:[%s2918_s3] sm:$0xff]   ;;  %v2177_v2 = vld [vmem:[%s2918_s3 + $0x10] sm:$0xff]   ;;  %v2178_v3 = vld [vmem:[%s2918_s3 + $0x18] sm:$0xff]   ;;  %p2294_p11 = scmp.ne.s32.totalorder %s2871_s17, %s2293_s23  ;;  %p2301_p1 = scmp.lt.s32.totalorder %s2299_s28, %s2293_s23 }
  0x21   : > { %1969 = vmatpush3.bf16.msra.mxu1 %v2145_v19  ;;  %v2179_v4 = vld [vmem:[%s2918_s3 + $0x20] sm:$0xff]   ;;  %v2180_v5 = vld [vmem:[%s2918_s3 + $0x28] sm:$0xff]   ;;  %v2181_v6 = vld [vmem:[%s2918_s3 + $0x30] sm:$0xff]  }
  0x22   : > { %1970 = vmatprep.subr.bf16.mxu1 %v2148_v22  ;;  %v2182_v7 = vld [vmem:[%s2918_s3 + $0x38] sm:$0xff]   ;;  %v2183_v8 = vld [vmem:[%s2920_s5] sm:$0xff]   ;;  %v2190_v38 = vld [vmem:[%s2922_s7 + $0xc] ss:$28 sps:$4 sm:$0xff]   ;;  %p2295_p12 = pnand %p2294_p11, %p2449_p5  ;;  %p2302_p2 = por %p2301_p1, %p2300_p0 }
  0x23   : > { %1949 = vmatpush3.bf16.msra.mxu0 %v2147_v21  ;;  %v1800_v10 = vld [vmem:[%s2917_s2] ss:$0 sm:$0xff]  ;;  %v2188_v37 = vld [vmem:[%s2922_s7 + $0x8] ss:$28 sps:$4 sm:$0xff]   ;;  %v2191_v62 = vld [vmem:[%s2922_s7 + $0x38] ss:$28 sps:$4 sm:$0xff]  }
  0x24   : > { %1950 = vmatprep.subr.bf16.mxu0 %v2150_v24  ;;  %v2194_v40 = vld [vmem:[%s2922_s7 + $0x40] ss:$28 sps:$4 sm:$0xff]   ;;  %p2296_p13 = pneg %p2295_p12 }
  0x25   : > { %1971 = vmatpush3.bf16.msra.mxu1 %v2149_v23 }
  0x26   : > { %1972 = vmatprep.subr.bf16.mxu1 %v2152_v26  ;;  %p2303_p3 = pnand %p2302_p2, %p2296_p13 }
  0x27   : > { %1951 = vmatpush3.bf16.msra.mxu0 %v2151_v25 }
  0x28   : > { %1952 = vmatprep.subr.bf16.mxu0 %v2154_v28 }
  0x29   : > { %1973 = vmatpush3.bf16.msra.mxu1 %v2153_v27 }
  0x2a   : > { %1974 = vmatprep.subr.bf16.mxu1 %v2156_v30 }
  0x2b   : > { %1953 = vmatpush3.bf16.msra.mxu0 %v2155_v29 }
  0x2c   : > { %1982 = vmatprep.subr.bf16.mxu0 %v2158_v36  ;;  %v2187_v36 = vld [vmem:[%s2922_s7 + $0x4] ss:$28 sps:$4 sm:$0xff]  }
  0x2d   : > { %1975 = vmatpush3.bf16.msra.mxu1 %v2157_v33 }
  0x2e   : > { %782 = vmatmul.mubr.bf16.vlgmr.msra.gmra.mrb[0].mxu0 %v339_v35  ;;  %2027 = vmatprep.subr.bf16.mxu1 %v2357_v44  ;;  %v2184_v35 = vld [vmem:[%s2920_s5 + $0x8] sm:$0xff]  }
  0x2f   : > { %1983 = vmatpush3.bf16.msra.mxu0 %v2159_v39  ;;  %861 = vmatprep.mubr.bf16.mxu0 %v344_v56  ;;  %v2196_v39 = vld [vmem:[%s2922_s7 + $0x44] ss:$28 sps:$4 sm:$0xff]  }
  0x30   : > { %822 = vmatmul.mubr.bf16.vlgmr.msra.gmra.mrb[0].mxu1 %v341_v41  ;;  %1984 = vmatprep.subr.bf16.mxu0 %v2160_v42  ;;  %v2202_v41 = vld [vmem:[%s2922_s7 + $0x7c] ss:$28 sps:$4 sm:$0xff]  }
  0x31   : > { %2029 = vmatprep.mubr.msk.bf16.mxu1 %vm2358_vm0, %v2357_v44  ;;  %2028 = vmatpush3.bf16.msra.mxu1 %v2174_v53  ;;  %v2200_v42 = vld [vmem:[%s2922_s7 + $0x78] ss:$28 sps:$4 sm:$0xff]  }
  0x32   : > { %2033 = vmatprep.subr.bf16.mxu1 %v2357_v44 }
  0x33   : > { %1985 = vmatpush3.bf16.msra.mxu0 %v2161_v43  ;;  %v2208_v43 = vld [vmem:[%s2922_s7 + $0xb4] ss:$28 sps:$4 sm:$0xff]  }
  0x34   : > { %1986 = vmatprep.subr.bf16.mxu0 %v2162_v45  ;;  %v2206_v45 = vld [vmem:[%s2922_s7 + $0xb0] ss:$28 sps:$4 sm:$0xff]  }
  0x37   : > { %1987 = vmatpush3.bf16.msra.mxu0 %v2163_v46  ;;  %v2214_v46 = vld [vmem:[%s2922_s7 + $0xec] ss:$28 sps:$4 sm:$0xff]  }
  0x38   : > { %1988 = vmatprep.subr.bf16.mxu0 %v2164_v47  ;;  %2030 = vmatmul.mubr.msk.bf16.vlgmr.msra.gmra.mrb[4].mxu1 %vm745_vm1, %v345_v58  ;;  %v2212_v47 = vld [vmem:[%s2922_s7 + $0xe8] ss:$28 sps:$4 sm:$0xff]  }
  0x39   : > { %2049 = vmatprep.mubr.msk.bf16.mxu1 %vm2358_vm0, %v2357_v44  ;;  %2034 = vmatpush3.bf16.msra.mxu1 %v2175_v0  ;;  %v2197_v0 = vld [vmem:[%s2922_s7 + $0x70] ss:$28 sps:$4 sm:$0xff]  }
  0x3a   : > { %2035 = vmatprep.subr.bf16.mxu1 %v2357_v44 }
  0x3b   : > { %1989 = vmatpush3.bf16.msra.mxu0 %v2165_v48  ;;  %v2220_v48 = vld [vmem:[%s2922_s7 + $0x124] ss:$28 sps:$4 sm:$0xff]  }
  0x3c   : > { %1990 = vmatprep.subr.bf16.mxu0 %v2166_v49  ;;  %v2218_v49 = vld [vmem:[%s2922_s7 + $0x120] ss:$28 sps:$4 sm:$0xff]  }
  0x3d   : > { %2036 = vmatpush3.bf16.msra.mxu1 %v2176_v1  ;;  %v2205_v1 = vld [vmem:[%s2922_s7 + $0xac] ss:$28 sps:$4 sm:$0xff]  }
  0x3e   : > { %2037 = vmatprep.subr.bf16.mxu1 %v2357_v44 }
  0x3f   : > { %1991 = vmatpush3.bf16.msra.mxu0 %v2167_v50  ;;  %v2226_v50 = vld [vmem:[%s2922_s7 + $0x15c] ss:$28 sps:$4 sm:$0xff]  }
  0x40   : > { %1992 = vmatprep.subr.bf16.mxu0 %v2168_v51  ;;  %v2224_v51 = vld [vmem:[%s2922_s7 + $0x158] ss:$28 sps:$4 sm:$0xff]  }
  0x41   : > { %2038 = vmatpush3.bf16.msra.mxu1 %v2177_v2  ;;  %v2203_v2 = vld [vmem:[%s2922_s7 + $0xa8] ss:$28 sps:$4 sm:$0xff]  }
  0x42   : > { %2039 = vmatprep.subr.bf16.mxu1 %v2357_v44 }
  0x43   : > { %1993 = vmatpush3.bf16.msra.mxu0 %v2169_v52  ;;  %v1851_v52 = vld [vmem:[%s2919_s4] ss:$0 sm:$0xff] }
  0x44   : > { %1994 = vmatprep.subr.bf16.mxu0 %v2170_v55 }
  0x45   : > { %2040 = vmatpush3.bf16.msra.mxu1 %v2178_v3  ;;  %v2211_v3 = vld [vmem:[%s2922_s7 + $0xe4] ss:$28 sps:$4 sm:$0xff]  }
  0x46   : > { %2041 = vmatprep.subr.bf16.mxu1 %v2357_v44 }
  0x47   : > { %1995 = vmatpush3.bf16.msra.mxu0 %v2171_v59  ;;  %v2185_v59 = vld [vmem:[%s2922_s7] ss:$28 sps:$4 sm:$0xff]  }
  0x48   : > { %1996 = vmatprep.subr.bf16.mxu0 %v2172_v60 }
  0x49   : > { %2042 = vmatpush3.bf16.msra.mxu1 %v2179_v4  ;;  %v2209_v4 = vld [vmem:[%s2922_s7 + $0xe0] ss:$28 sps:$4 sm:$0xff]  }
  0x4a   : > { %2043 = vmatprep.subr.bf16.mxu1 %v2357_v44 }
  0x4b   : > { %1997 = vmatpush3.bf16.msra.mxu0 %v2173_v61  ;;  %v2193_v61 = vld [vmem:[%s2922_s7 + $0x3c] ss:$28 sps:$4 sm:$0xff]  }
  0x4c   : > { %2053 = vmatprep.subr.bf16.mxu0 %v2357_v44 }
  0x4d   : > { %2044 = vmatpush3.bf16.msra.mxu1 %v2180_v5  ;;  %v2217_v5 = vld [vmem:[%s2922_s7 + $0x11c] ss:$28 sps:$4 sm:$0xff]  }
  0x4e   : > { %862 = vmatmul.mubr.bf16.vlgmr.msra.gmra.mrb[4].mxu0 %v343_v63  ;;  %2045 = vmatprep.subr.bf16.mxu1 %v2357_v44  ;;  %v2199_v63 = vld [vmem:[%s2922_s7 + $0x74] ss:$28 sps:$4 sm:$0xff]  }
  0x4f   : > { %2057 = vmatprep.mubr.msk.bf16.mxu0 %vm2358_vm0, %v2357_v44  ;;  %2054 = vmatpush3.bf16.msra.mxu0 %v2183_v8  ;;  %v2221_v8 = vld [vmem:[%s2922_s7 + $0x150] ss:$28 sps:$4 sm:$0xff]  }
  0x50   : > { %2055 = vmatprep.subr.bf16.mxu0 %v2357_v44 }
  0x51   : > { %2046 = vmatpush3.bf16.msra.mxu1 %v2181_v6  ;;  %v2215_v6 = vld [vmem:[%s2922_s7 + $0x118] ss:$28 sps:$4 sm:$0xff]  }
  0x52   : > { %2047 = vmatprep.subr.bf16.mxu1 %v2357_v44 }
  0x53   : > { %2056 = vmatpush3.bf16.msra.mxu0 %v2184_v35  ;;  %v2249_v35 = vld [vmem:[%s2922_s7 + $0xf0] ss:$28 sps:$4 sm:$0xff]  }
  0x54   : > { %1482 = vmatprep.subr.bf16.mxu0 %v2187_v36  ;;  %v2252_v36 = vld [vmem:[%s2922_s7 + $0xf8] ss:$28 sps:$4 sm:$0xff]  }
  0x55   : > { %2048 = vmatpush3.bf16.msra.mxu1 %v2182_v7  ;;  %v2223_v7 = vld [vmem:[%s2922_s7 + $0x154] ss:$28 sps:$4 sm:$0xff]  }
  0x56   : > { %1523 = vmatprep.subr.bf16.mxu1 %v2190_v38  ;;  %v2253_v38 = vld [vmem:[%s2922_s7 + $0x128] ss:$28 sps:$4 sm:$0xff]  }
 0x101   : > { %v1954_v9 = vpop.f32.mrb[0].mxu0 }
 0x102   : > { %v1955_v11 = vpop.f32.mrb[1].mxu0 }
 0x103   : > { %v1956_v12 = vadd.f32 %v1955_v11, %v1954_v9  ;;  %v1957_v13 = vpop.f32.mrb[2].mxu0  ;;  %v1976_v14 = vpop.f32.mrb[0].mxu1  ;;  %v2229_v9 = vld [vmem:[%s2922_s7 + $0x18c] ss:$28 sps:$4 sm:$0xff]  }
 0x104   : > { %v1958_v15 = vpop.f32.mrb[3].mxu0  ;;  %v1977_v17 = vpop.f32.mrb[1].mxu1  ;;  %v2227_v11 = vld [vmem:[%s2922_s7 + $0x188] ss:$28 sps:$4 sm:$0xff]   ;;  %v2235_v13 = vld [vmem:[%s2922_s7 + $0x14] ss:$28 sps:$4 sm:$0xff]  }
 0x105   : > { %v784_v16 = vadd.f32 %v1956_v12, %v1800_v10  ;;  %v1978_v18 = vadd.f32 %v1977_v17, %v1976_v14  ;;  %v1979_v19 = vpop.f32.mrb[2].mxu1  ;;  %v2232_v10 = vld [vmem:[%s2922_s7 + $0x194] ss:$28 sps:$4 sm:$0xff]   ;;  %v2359_v14 = vmov 0   ;;  %v1860_v15 = vld [vmem:[%s2921_s6] ss:$0 sm:$0xff] }
 0x106   : > { %v1980_v20 = vpop.f32.mrb[3].mxu1  ;;  %v2230_v12 = vld [vmem:[%s2922_s7 + $0x190] ss:$28 sps:$4 sm:$0xff]  }
 0x107   : > { %v824_v21 = vadd.f32 %v1978_v18, %v784_v16 }
 0x10b   : > { %v903_v22 = vpop.f32.mrb[4].mxu1 }
 0x10c   : > { %v2031_v23 = vpop.f32.mrb[5].mxu1 }
 0x10d   : > { %v906_v24 = vpop.f32.mrb[6].mxu1  ;;  %v2236_v23 = vld [vmem:[%s2922_s7 + $0x18] ss:$28 sps:$4 sm:$0xff]  }
 0x10e   : > { %v2032_v25 = vpop.f32.mrb[7].mxu1 }
 0x10f   : > { %v2239_v25 = vld [vmem:[%s2922_s7 + $0x4c] ss:$28 sps:$4 sm:$0xff]  }
 0x121   : > { %v1998_v26 = vpop.f32.mrb[4].mxu0 }
 0x122   : > { %v1999_v27 = vpop.f32.mrb[5].mxu0 }
 0x123   : > { %v2000_v28 = vadd.f32 %v1999_v27, %v1998_v26  ;;  %v2001_v29 = vpop.f32.mrb[6].mxu0  ;;  %v2237_v26 = vld [vmem:[%s2922_s7 + $0x48] ss:$28 sps:$4 sm:$0xff]   ;;  %v2240_v27 = vld [vmem:[%s2922_s7 + $0x50] ss:$28 sps:$4 sm:$0xff]  }
 0x124   : > { %v2002_v30 = vpop.f32.mrb[7].mxu0  ;;  %v2241_v29 = vld [vmem:[%s2922_s7 + $0x80] ss:$28 sps:$4 sm:$0xff]  }
 0x125   : > { %v864_v31 = vadd.f32 %v2000_v28, %v824_v21  ;;  %v2243_v28 = vld [vmem:[%s2922_s7 + $0x84] ss:$28 sps:$4 sm:$0xff]  }
 0x126   : > { %v2244_v30 = vld [vmem:[%s2922_s7 + $0x88] ss:$28 sps:$4 sm:$0xff]  }
 0x127   : > { %v904_v32 = vadd.f32 %v903_v22, %v864_v31  ;;  %v2233_v22 = vld [vmem:[%s2922_s7 + $0x10] ss:$28 sps:$4 sm:$0xff]   ;;  %v2247_v31 = vld [vmem:[%s2922_s7 + $0xbc] ss:$28 sps:$4 sm:$0xff]  }
 0x129   : > { %v909_v33 = vmax.f32 %v904_v32, 0.0  ;;  %v2245_v32 = vld [vmem:[%s2922_s7 + $0xb8] ss:$28 sps:$4 sm:$0xff]  }
 0x12b   : > { %v910_v34 = vpack.c.bf16 %v909_v33, %v909_v33  ;;  %v2248_v33 = vld [vmem:[%s2922_s7 + $0xc0] ss:$28 sps:$4 sm:$0xff]  }
 0x12d   : > { %2050 = vmatmul.mubr.bf16.vlgmr.msra.gmra.mrb[8].mxu1 %v910_v34  ;;  %v2251_v34 = vld [vmem:[%s2922_s7 + $0xf4] ss:$28 sps:$4 sm:$0xff]  }
 0x12e   : > { %1524 = vmatpush1.bf16.msra.mxu1 %v2188_v37  ;;  %1555 = vmatprep.mubr.bf16.mxu1 %v2359_v14  ;;  %v2255_v37 = vld [vmem:[%s2922_s7 + $0x12c] ss:$28 sps:$4 sm:$0xff]  }
 0x12f   : > { %1525 = vmatprep.subr.bf16.mxu1 %v2196_v39  ;;  %v2256_v39 = vld [vmem:[%s2922_s7 + $0x130] ss:$28 sps:$4 sm:$0xff]  }
 0x132   : > { %1526 = vmatpush1.bf16.msra.mxu1 %v2194_v40  ;;  %v2259_v40 = vld [vmem:[%s2922_s7 + $0x164] ss:$28 sps:$4 sm:$0xff]  }
 0x133   : > { %1527 = vmatprep.subr.bf16.mxu1 %v2202_v41  ;;  %v2257_v41 = vld [vmem:[%s2922_s7 + $0x160] ss:$28 sps:$4 sm:$0xff]  }
 0x136   : > { %1528 = vmatpush1.bf16.msra.mxu1 %v2200_v42  ;;  %v2260_v42 = vld [vmem:[%s2922_s7 + $0x168] ss:$28 sps:$4 sm:$0xff]  }
 0x137   : > { %1529 = vmatprep.subr.bf16.mxu1 %v2208_v43  ;;  %v2263_v43 = vld [vmem:[%s2922_s7 + $0x19c] ss:$28 sps:$4 sm:$0xff]  }
 0x13a   : > { %1530 = vmatpush1.bf16.msra.mxu1 %v2206_v45  ;;  %v2261_v45 = vld [vmem:[%s2922_s7 + $0x198] ss:$28 sps:$4 sm:$0xff]  }
 0x13b   : > { %1531 = vmatprep.subr.bf16.mxu1 %v2214_v46  ;;  %v2264_v46 = vld [vmem:[%s2922_s7 + $0x1a0] ss:$28 sps:$4 sm:$0xff]  }
 0x13e   : > { %1532 = vmatpush1.bf16.msra.mxu1 %v2212_v47  ;;  %v1159_v47 = vlaneseq }
 0x13f   : > { %1533 = vmatprep.subr.bf16.mxu1 %v2220_v48 }
 0x140   : > { %v1160_v48 = vshrl.u32 %v1159_v47, 7 }
 0x142   : > { %1534 = vmatpush1.bf16.msra.mxu1 %v2218_v49  ;;  %v1161_v49 = vsub.s32 0, %v1160_v48 }
 0x143   : > { %1535 = vmatprep.subr.bf16.mxu1 %v2226_v50  ;;  %v1169_v50 = vsub.s32 2, %v1160_v48 }
 0x146   : > { %1536 = vmatpush1.bf16.msra.mxu1 %v2224_v51  ;;  %v1157_v51 = vld [vmem:[%s2923_s8] sm:$0x7f] }
 0x147   : > { %1537 = vmatprep.subr.bf16.mxu1 %v2232_v10 }
 0x14a   : > { %1538 = vmatpush1.bf16.msra.mxu1 %v2230_v12 }
 0x14b   : > { %2061 = vmatprep.subr.bf16.mxu1 %v2357_v44 }
 0x200   : > { %v1016_v53 = vpop.f32.mrb[8].mxu1 }
 0x201   : > { %v1017_v54 = vadd.f32 %v1851_v52, %v1016_v53  ;;  %v2051_v55 = vpop.f32.mrb[9].mxu1  ;;  %v1165_v52 = vsub.s32 1, %v1160_v48  ;;  %v1173_v53 = vsub.s32 3, %v1160_v48 }
 0x202   : > { %v1019_v56 = vpop.f32.mrb[10].mxu1  ;;  %v1170_v55 = vrot.slane %v1157_v51, %v1169_v50 }
 0x203   : > { %v1022_v57 = vmax.f32 %v1017_v54, 0.0  ;;  %v2052_v58 = vpop.f32.mrb[11].mxu1  ;;  %v1162_v54 = vrot.slane %v1157_v51, %v1161_v49  ;;  %v1166_v56 = vrot.slane %v1157_v51, %v1165_v52 }
 0x205   : > { %v1023_v60 = vpack.c.bf16 %v1022_v57, %v1022_v57  ;;  %v1174_v57 = vrot.slane %v1157_v51, %v1173_v53 }
 0x207   : > { %2058 = vmatmul.mubr.msk.bf16.vlgmr.msra.gmra.mrb[8].mxu0 %vm1047_vm2, %v1023_v60 }
 0x208   : > { %1483 = vmatpush1.bf16.msra.mxu0 %v2185_v59  ;;  %1514 = vmatprep.mubr.bf16.mxu0 %v2359_v14 }
 0x209   : > { %1484 = vmatprep.subr.bf16.mxu0 %v2193_v61 }
 0x20c   : > { %1485 = vmatpush1.bf16.msra.mxu0 %v2191_v62 }
 0x20d   : > { %1486 = vmatprep.subr.bf16.mxu0 %v2199_v63 }
 0x210   : > { %1487 = vmatpush1.bf16.msra.mxu0 %v2197_v0 }
 0x211   : > { %1488 = vmatprep.subr.bf16.mxu0 %v2205_v1 }
 0x214   : > { %1489 = vmatpush1.bf16.msra.mxu0 %v2203_v2 }
 0x215   : > { %1490 = vmatprep.subr.bf16.mxu0 %v2211_v3 }
 0x218   : > { %1491 = vmatpush1.bf16.msra.mxu0 %v2209_v4 }
 0x219   : > { %1492 = vmatprep.subr.bf16.mxu0 %v2217_v5 }
 0x21c   : > { %1493 = vmatpush1.bf16.msra.mxu0 %v2215_v6 }
 0x21d   : > { %1494 = vmatprep.subr.bf16.mxu0 %v2223_v7 }
 0x220   : > { %1495 = vmatpush1.bf16.msra.mxu0 %v2221_v8 }
 0x221   : > { %1496 = vmatprep.subr.bf16.mxu0 %v2229_v9 }
 0x224   : > { %1497 = vmatpush1.bf16.msra.mxu0 %v2227_v11 }
 0x225   : > { %1564 = vmatprep.subr.bf16.mxu0 %v2235_v13 }
 0x2da   : > { %v1085_v16 = vpop.f32.mrb[8].mxu0 }
 0x2db   : > { %v1086_v17 = vadd.f32 %v1860_v15, %v1085_v16  ;;  %v2059_v18 = vpop.f32.mrb[9].mxu0 }
 0x2dc   : > { %v1088_v19 = vpop.f32.mrb[10].mxu0  ;;  %v1185_v18 = vsub.s32 6, %v1160_v48 }
 0x2dd   : > { %v1091_v20 = vmax.f32 %v1086_v17, 0.0  ;;  %v2060_v21 = vpop.f32.mrb[11].mxu0  ;;  %v1177_v17 = vsub.s32 4, %v1160_v48  ;;  %v1181_v19 = vsub.s32 5, %v1160_v48 }
 0x2df   : > { %v1092_v24 = vpack.c.bf16 %v1091_v20, %v1091_v20 }
 0x2e1   : > { %1515 = vmatmul.mubr.bf16.vlgmr.msra.gmra.mrb[12].mxu0 %v1092_v24  ;;  %1556 = vmatmul.mubr.bf16.vlgmr.msra.gmra.mrb[12].mxu1 %v1092_v24 }
 0x2e2   : > { %1565 = vmatpush1.bf16.msra.mxu0 %v2233_v22  ;;  %2062 = vmatpush3.bf16.msra.mxu1 %v2236_v23  ;;  %v1178_v22 = vrot.slane %v1157_v51, %v1177_v17  ;;  %v1186_v23 = vrot.slane %v1157_v51, %v1185_v18 }
 0x2e3   : > { %1566 = vmatprep.subr.bf16.mxu0 %v2239_v25  ;;  %2063 = vmatprep.subr.bf16.mxu1 %v2357_v44  ;;  %v1182_v25 = vrot.slane %v1157_v51, %v1181_v19 }
 0x2e4   : > { %1596 = vmatprep.mubr.bf16.mxu0 %v2359_v14  ;;  %2077 = vmatprep.mubr.msk.bf16.mxu1 %vm2358_vm0, %v2357_v44 }
 0x2e6   : > { %1567 = vmatpush1.bf16.msra.mxu0 %v2237_v26  ;;  %2064 = vmatpush3.bf16.msra.mxu1 %v2240_v27 }
 0x2e7   : > { %1568 = vmatprep.subr.bf16.mxu0 %v2243_v28  ;;  %2065 = vmatprep.subr.bf16.mxu1 %v2357_v44 }
 0x2ea   : > { %1569 = vmatpush1.bf16.msra.mxu0 %v2241_v29  ;;  %2066 = vmatpush3.bf16.msra.mxu1 %v2244_v30 }
 0x2eb   : > { %1570 = vmatprep.subr.bf16.mxu0 %v2247_v31  ;;  %2067 = vmatprep.subr.bf16.mxu1 %v2357_v44 }
 0x2ee   : > { %1571 = vmatpush1.bf16.msra.mxu0 %v2245_v32  ;;  %2068 = vmatpush3.bf16.msra.mxu1 %v2248_v33 }
 0x2ef   : > { %1572 = vmatprep.subr.bf16.mxu0 %v2251_v34  ;;  %2069 = vmatprep.subr.bf16.mxu1 %v2357_v44 }
 0x2f2   : > { %1573 = vmatpush1.bf16.msra.mxu0 %v2249_v35  ;;  %2070 = vmatpush3.bf16.msra.mxu1 %v2252_v36 }
 0x2f3   : > { %1574 = vmatprep.subr.bf16.mxu0 %v2255_v37  ;;  %2071 = vmatprep.subr.bf16.mxu1 %v2357_v44 }
 0x2f6   : > { %1575 = vmatpush1.bf16.msra.mxu0 %v2253_v38  ;;  %2072 = vmatpush3.bf16.msra.mxu1 %v2256_v39 }
 0x2f7   : > { %1576 = vmatprep.subr.bf16.mxu0 %v2259_v40  ;;  %2073 = vmatprep.subr.bf16.mxu1 %v2357_v44 }
 0x2fa   : > { %1577 = vmatpush1.bf16.msra.mxu0 %v2257_v41  ;;  %2074 = vmatpush3.bf16.msra.mxu1 %v2260_v42 }
 0x2fb   : > { %1578 = vmatprep.subr.bf16.mxu0 %v2263_v43  ;;  %2075 = vmatprep.subr.bf16.mxu1 %v2357_v44 }
 0x2fe   : > { %1579 = vmatpush1.bf16.msra.mxu0 %v2261_v45  ;;  %2076 = vmatpush3.bf16.msra.mxu1 %v2264_v46 }
 0x301   : > { %1597 = vmatmul.mubr.bf16.vlgmr.msra.gmra.mrb[16].mxu0 %v1092_v24  ;;  %2078 = vmatmul.mubr.bf16.vlgmr.msra.gmra.mrb[16].mxu1 %v1092_v24 }
 0x3b4   : > { %v1516_v58 = vpop.f32.mrb[12].mxu0  ;;  %v1557_v44 = vpop.f32.mrb[12].mxu1 }
 0x3b5   : > { %v1517_v59 = vadd.f32 %v1516_v58, %v1162_v54  ;;  %v1558_v60 = vadd.f32 %v1557_v44, %v1170_v55  ;;  %v1518_v61 = vpop.f32.mrb[13].mxu0  ;;  %v1559_v62 = vpop.f32.mrb[13].mxu1 }
 0x3b6   : > { %v1519_v63 = vadd.f32 %v1518_v61, %v1166_v56  ;;  %v1560_v0 = vadd.f32 %v1559_v62, %v1174_v57  ;;  %v1520_v1 = vpop.f32.mrb[14].mxu0  ;;  %v1561_v2 = vpop.f32.mrb[14].mxu1 }
 0x3b7   : > { %v1920_v3 = vmul.f32 -1.442695, %v1517_v59  ;;  %v1922_v4 = vmul.f32 -1.442695, %v1558_v60  ;;  %v1521_v5 = vpop.f32.mrb[15].mxu0  ;;  %v1562_v6 = vpop.f32.mrb[15].mxu1 }
 0x3b8   : > { %v1921_v7 = vmul.f32 -1.442695, %v1519_v63  ;;  %v1923_v8 = vmul.f32 -1.442695, %v1560_v0 }
 0x3b9   : > { %2265 = vpow2.f32 %v1920_v3 }
 0x3ba   : > { %2267 = vpow2.f32 %v1922_v4 }
 0x3bb   : > { %2269 = vpow2.f32 %v1921_v7 }
 0x3bc   : > { %2271 = vpow2.f32 %v1923_v8 }
 0x3c3   : > { %v2266_v9 = vpop.eup %2265 }
 0x3c4   : > { %v2268_v10 = vpop.eup %2267  ;;  %v1666_v11 = vadd.f32 1.0, %v2266_v9 }
 0x3c5   : > { %v2270_v12 = vpop.eup %2269  ;;  %v1668_v13 = vadd.f32 1.0, %v2268_v10 }
 0x3c6   : > { %v2272_v14 = vpop.eup %2271  ;;  %2273 = vrcp.f32 %v1666_v11  ;;  %v1667_v15 = vadd.f32 1.0, %v2270_v12 }
 0x3c7   : > { %2275 = vrcp.f32 %v1668_v13  ;;  %v1669_v16 = vadd.f32 1.0, %v2272_v14 }
 0x3c8   : > { %2277 = vrcp.f32 %v1667_v15 }
 0x3c9   : > { %2279 = vrcp.f32 %v1669_v16 }
 0x3d0   : > { %v2274_v20 = vpop.eup %2273 }
 0x3d1   : > { %v2276_v21 = vpop.eup %2275 }
 0x3d2   : > { %v2278_v24 = vpop.eup %2277 }
 0x3d3   : > { %v2280_v26 = vpop.eup %2279  ;;  %v1934_v27 = vpack.c.bf16 %v2278_v24, %v2274_v20 }
 0x3d4   : > { %v1598_v28 = vpop.f32.mrb[16].mxu0  ;;  %v1639_v29 = vpop.f32.mrb[16].mxu1  ;;  %v1935_v30 = vpack.c.bf16 %v2280_v26, %v2276_v21 }
 0x3d5   : > { %v1599_v31 = vadd.f32 %v1598_v28, %v1178_v22  ;;  %v1640_v32 = vadd.f32 %v1639_v29, %v1186_v23  ;;  %v1600_v33 = vpop.f32.mrb[17].mxu0  ;;  %v2079_v34 = vpop.f32.mrb[17].mxu1  ;;  %1716 = vst [vmem:[%s2860_s14] sm:$0xff] %v1934_v27 }
 0x3d6   : > { %v1601_v35 = vadd.f32 %v1600_v33, %v1182_v25  ;;  %v1602_v36 = vpop.f32.mrb[18].mxu0  ;;  %v1642_v37 = vpop.f32.mrb[18].mxu1  ;;  %1717 = vst [vmem:[%s2860_s14 + $0x8] sm:$0xff] %v1935_v30 }
 0x3d7   : > { %v1924_v38 = vmul.f32 -1.442695, %v1599_v31  ;;  %v1926_v39 = vmul.f32 -1.442695, %v1640_v32  ;;  %v1603_v40 = vpop.f32.mrb[19].mxu0  ;;  %v2080_v41 = vpop.f32.mrb[19].mxu1 }
 0x3d8   : > { %v1925_v42 = vmul.f32 -1.442695, %v1601_v35 }
 0x3d9   : > { %2281 = vpow2.f32 %v1924_v38 }
 0x3da   : > { %2283 = vpow2.f32 %v1926_v39 }
 0x3db   : > { %2285 = vpow2.f32 %v1925_v42 }
 0x3e3   : > { %v2282_v43 = vpop.eup %2281 }
 0x3e4   : > { %v2284_v45 = vpop.eup %2283  ;;  %v1670_v46 = vadd.f32 1.0, %v2282_v43 }
 0x3e5   : > { %v2286_v47 = vpop.eup %2285  ;;  %v1672_v48 = vadd.f32 1.0, %v2284_v45 }
 0x3e6   : > { %2287 = vrcp.f32 %v1670_v46  ;;  %v1671_v49 = vadd.f32 1.0, %v2286_v47 }
 0x3e7   : > { %2289 = vrcp.f32 %v1672_v48 }
 0x3e8   : > { %2291 = vrcp.f32 %v1671_v49 }
 0x3f0   : > { %v2288_v50 = vpop.eup %2287 }
 0x3f1   : > { %v2290_v51 = vpop.eup %2289 }
 0x3f2   : > { %v2292_v52 = vpop.eup %2291  ;;  %v1937_v53 = vpack.c.bf16 %v2290_v51, %v2290_v51 }
 0x3f3   : > { %v1936_v54 = vpack.c.bf16 %v2292_v52, %v2288_v50 }
 0x3f4   : > { %1720 = vst.msk [vmem:[%s2860_s14 + $0x18] sm:$0xf] %vm1719_vm3, %v1937_v53 }
 0x3f5   : > { %1718 = vst [vmem:[%s2860_s14 + $0x10] sm:$0xff] %v1936_v54 }
 0x3f6   : > { %2306 = shalt.err (!%p2303_p3)
}
 0x3f7   : > { %s2307_s29 = scalar_lea.hbm %s2869_s22, 448  ;;  %s2311_s16 = scalar_lea.hbm %s2924_s9, 896 }
 0x3f8   : > { %p2308_p4 = scmp.ne.s32.totalorder %s2869_s22, %s2307_s29  ;;  %p2312_p9 = scmp.lt.u32.totalorder %s2869_s22, %s2924_s9 }
 0x3f9   : > { %p2313_p10 = scmp.lt.u32.totalorder %s2311_s16, %s2307_s29  ;;  %p2315_p12 = scmp.lt.u32.totalorder %s2307_s29, %s2869_s22 }
 0x3fa   : > { %p2309_p7 = pnand %p2308_p4, %p2449_p5 }
 0x3fb   : > { %p2314_p11 = por %p2313_p10, %p2312_p9 }
 0x3fc   : > { %p2310_p8 = pneg %p2309_p7 }
 0x3fd   : > { %p2316_p13 = por %p2315_p12, %p2314_p11 }
 0x3ff   : > { %p2317_p0 = pnand %p2316_p13, %p2310_p8 }
 0x401   : > { %2320 = shalt.err (!%p2317_p0)
}
 0x402   : > { %2084 = dma.vmem_to_hbm [thread:$0]  (%p2449_p5), %s2871_s17, 448, %s2869_s22, %s1722_s13  }
 0x403 PF: > { %p2090_p1 = scmp.ge.s32.totalorder %s2355_s12, 2  ;;  %s1748_s23 = sand.u32 1, %s2343_s30  }
 0x404   : > { %s1749_s25 = scalar_lea.sflag [#allocation3], %s1748_s23 }
 0x405   : > { %p2087_p2 = pnand %p2090_p1, %p2453_p6 }
 0x407   : > { %2338 = dma.done.wait (!%p2087_p2), %s1749_s25, 448  }
 0x408   : > { %2340 = vsyncadd (!%p2087_p2), %s1749_s25, 4294966848  ;;  %p19_p3 = scmp.ge.s32.totalorder %s2436_s15, 4   ;;  %s2927_s30 = smov %s2347_s10 }
 0x409   : > { %s2928_s10 = smov %s2351_s11  ;;  %s2929_s11 = smov %s2447_s18 }
 0x40a   : > { %s2930_s12 = smov %s2436_s15  ;;  %21 = sbr.rel (!%p19_p3) target bundleno = 3 (0x3), region = 91 }
 0x411   :  { %1754 = vsyncpa [#allocation3], 1 }
 0x412   :  { %1756 = vsyncpa [#allocation3 + $0x1], 1 }

</bundles_post_ra>
